<compile_context>
chip_gen: v6e
topology: v6e:2x2x1
jax: 0.10.0
libtpu: 0.0.40
codegen_flags: <defaults>
</compile_context>

<pallas_src>
import math
from functools import partial

import jax
import jax.numpy as jnp
import numpy as np
from jax.experimental import pallas as pl
from jax.experimental.pallas import tpu as pltpu

# ---------------- small synthetic configuration ----------------
D_MODEL = 32
N_LEVELS = 4
N_HEADS = 4
N_POINTS = 4

VMEM_LIMIT = 32 * 1024 * 1024  # explicit scoped-VMEM budget (safe on v5e/v6e/v7x)


def _round_up(x, m):
    return (x + m - 1) // m * m


# ---------------- Pallas tiled linear (matmul) kernels ----------------
def _linear_kernel(x_ref, w_ref, b_ref, o_ref):
    o_ref[...] = (
        jnp.dot(x_ref[...], w_ref[...], preferred_element_type=jnp.float32)
        + b_ref[...]
    )


def _linear_mask_kernel(x_ref, w_ref, b_ref, m_ref, o_ref):
    y = (jnp.dot(x_ref[...], w_ref[...], preferred_element_type=jnp.float32)
         + b_ref[...])
    # padding-mask fused into the projection: masked rows are written as zeros
    o_ref[...] = jnp.where(m_ref[...] > 0.5, 0.0, y)


def linear(x, w, b, *, mask=None, block_m=1024):
    """x: (M, K) @ w: (K, N) + b: (N,).  M-tiled (HBM-bound, so large block_m to
    amortize per-step overhead).  Optional per-row mask (True -> zero the row)."""
    M, K = x.shape
    Nout = w.shape[1]
    tm = M if M <= block_m else block_m
    in_specs = [
        pl.BlockSpec((tm, K), lambda i: (i, 0)),
        pl.BlockSpec((K, Nout), lambda i: (0, 0)),
        pl.BlockSpec((1, Nout), lambda i: (0, 0)),
    ]
    args = [x, w, b.reshape(1, Nout)]
    kernel = _linear_kernel
    if mask is not None:
        in_specs.append(pl.BlockSpec((tm, 1), lambda i: (i, 0)))
        args.append(mask.reshape(M, 1).astype(jnp.float32))
        kernel = _linear_mask_kernel
    return pl.pallas_call(
        kernel,
        grid=(pl.cdiv(M, tm),),
        out_shape=jax.ShapeDtypeStruct((M, Nout), jnp.float32),
        in_specs=in_specs,
        out_specs=pl.BlockSpec((tm, Nout), lambda i: (i, 0)),
        compiler_params=pltpu.CompilerParams(
            dimension_semantics=("parallel",),
            vmem_limit_bytes=VMEM_LIMIT),
    )(*args)


# ---------------- fused deformable sampling + output projection kernel ----------------
def _ms_deform_attn_kernel(qproj_ref, refs_ref, val_hbm, ow_ref, ob_ref, out_ref,
                           vscratch, dma_sems, *,
                           n_heads, n_levels, n_points, d_head, ref_dim,
                           spatial_shapes, level_start, level_start_pad,
                           mxu_dtype, approx_recip):
    """One grid step = one (batch, query-tile) pair.

    qproj_ref : VMEM f32 (1, tq, 3*nh*L*P)  fused [sampling offsets | attention logits]
    refs_ref  : VMEM f32 (1, tq, L*ref_dim) reference points
    val_hbm   : ANY/HBM   (N, Len_in, d_model) projected value (DMA'd per batch)
    ow_ref    : VMEM f32 (d_model, d_model)  output projection weight
    ob_ref    : VMEM f32 (1, d_model)        output projection bias
    out_ref   : VMEM f32 (1, tq, d_model)    final (already output-projected) result
    vscratch  : VMEM     (Len_pad, d_model)  single-buffered, level-aligned value slab
    dma_sems  : DMA semaphores, one per level
    """
    nh, L, P, Dh = n_heads, n_levels, n_points, d_head
    LP = L * P
    D = nh * Dh
    b = pl.program_id(0)

    # ---- once per batch: DMA each level's value rows to a sublane-aligned offset ----
    @pl.when(pl.program_id(1) == 0)
    def _():
        copies = []
        for l in range(L):
            H, W = spatial_shapes[l]
            hw = H * W
            cp = pltpu.make_async_copy(
                val_hbm.at[b, pl.ds(level_start[l], hw), :],
                vscratch.at[pl.ds(level_start_pad[l], hw), :],
                dma_sems.at[l])
            cp.start()
            copies.append(cp)
        for cp in copies:
            cp.wait()

    qproj = qproj_ref[0]                       # (tq, 3*nh*L*P)
    refs = refs_ref[0]                         # (tq, L*ref_dim)
    tq = qproj.shape[0]
    off_all = qproj[:, :nh * LP * 2]           # (tq, 2*nh*L*P) sampling offsets
    logit_all = qproj[:, nh * LP * 2:]         # (tq, nh*L*P)   attention logits

    # per-head softmax over the (levels * points) axis
    attn = []
    for h in range(nh):
        lg = logit_all[:, h * LP:(h + 1) * LP]
        m = jnp.max(lg, axis=-1, keepdims=True)
        e = jnp.exp(lg - m)
        s = jnp.sum(e, axis=-1, keepdims=True)
        if approx_recip:
            attn.append(e * pl.reciprocal(s, approx=True))   # EUP slot, VALU stays free
        else:
            attn.append(e / s)

    acc = jnp.zeros((nh * tq, D), jnp.float32)       # head-stacked accumulator
    for l in range(L):
        H, W = spatial_shapes[l]
        HW = H * W
        Hf, Wf = float(H), float(W)
        ls = level_start_pad[l]

        # hoisted per-level constants
        row_ids = jax.lax.broadcasted_iota(jnp.int32, (tq, H), 1)
        col_ids = jax.lax.broadcasted_iota(jnp.int32, (tq, W), 1)
        # Expansion one-hots: EY[y, j] = (j // W == y), EX[x, j] = (j % W == x).
        jj = jax.lax.broadcasted_iota(jnp.int32, (H, HW), 1)
        yy = jax.lax.broadcasted_iota(jnp.int32, (H, HW), 0)
        EY = ((jj >= yy * W) & (jj < (yy + 1) * W)).astype(jnp.float32)
        jf = jax.lax.broadcasted_iota(jnp.float32, (W, HW), 1)
        xf = jax.lax.broadcasted_iota(jnp.float32, (W, HW), 0)
        EX = ((jf - jnp.floor(jf / Wf) * Wf) == xf).astype(jnp.float32)

        if ref_dim == 2:
            rx = refs[:, 2 * l:2 * l + 1]
            ry = refs[:, 2 * l + 1:2 * l + 2]
        else:
            rx = refs[:, 4 * l:4 * l + 1]
            ry = refs[:, 4 * l + 1:4 * l + 2]
            rw = refs[:, 4 * l + 2:4 * l + 3]
            rh = refs[:, 4 * l + 3:4 * l + 4]

        A = jnp.zeros((nh * tq, HW), jnp.float32)
        # TODO(synk): convert this static nest to lax.fori_loop at production sizes
        #             to bound vreg live ranges.
        for p in range(P):
            oy_rows = []
            ox_rows = []
            for h in range(nh):
                c = (h * L + l) * P + p
                offx = off_all[:, 2 * c:2 * c + 1]          # (tq, 1)
                offy = off_all[:, 2 * c + 1:2 * c + 2]
                if ref_dim == 2:
                    # loc = ref + off / (W, H); grid_sample pixel = loc*size - 0.5
                    x = rx * Wf + offx - 0.5
                    y = ry * Hf + offy - 0.5
                else:
                    x = (rx + offx * (0.5 / P) * rw) * Wf - 0.5
                    y = (ry + offy * (0.5 / P) * rh) * Hf - 0.5
                x0f = jnp.floor(x)
                y0f = jnp.floor(y)
                fx = x - x0f
                fy = y - y0f
                x0 = x0f.astype(jnp.int32)
                y0 = y0f.astype(jnp.int32)
                w_lp = attn[h][:, l * P + p:l * P + p + 1]
                # separable one-hot row/col weights; OOB taps never match an in-range
                # index, so zero padding is implicit (attention weight folded into OY)
                oy_rows.append(jnp.where(row_ids == y0, (1.0 - fy) * w_lp, 0.0)
                               + jnp.where(row_ids == y0 + 1, fy * w_lp, 0.0))
                ox_rows.append(jnp.where(col_ids == x0, 1.0 - fx, 0.0)
                               + jnp.where(col_ids == x0 + 1, fx, 0.0))
            OY = jnp.concatenate(oy_rows, axis=0)            # (nh*tq, H)
            OX = jnp.concatenate(ox_rows, axis=0)            # (nh*tq, W)
            # expand the small per-axis one-hots to the flat (HW) axis on the MXU
            wy = jnp.dot(OY, EY, preferred_element_type=jnp.float32)
            wx = jnp.dot(OX, EX, preferred_element_type=jnp.float32)
            A = A + wy * wx                                  # 2 full-width VPU ops

        v_l = vscratch[ls:ls + HW, :]                        # (HW, D), aligned start
        acc = acc + jnp.dot(A.astype(mxu_dtype), v_l,
                            preferred_element_type=jnp.float32)

    # block-diagonal extraction: head h's output lives in rows [h*tq:(h+1)*tq] and
    # columns [h*Dh:(h+1)*Dh] of the head-stacked accumulator
    merged = jnp.concatenate(
        [acc[h * tq:(h + 1) * tq, h * Dh:(h + 1) * Dh] for h in range(nh)], axis=1)

    # fused output projection (saves an HBM round trip of the sampled tensor)
    out = (jnp.dot(merged.astype(mxu_dtype), ow_ref[...].astype(mxu_dtype),
                   preferred_element_type=jnp.float32) + ob_ref[...])
    out_ref[0] = out


# ---------------- module ----------------
class MSDeformAttnPallas:
    def __init__(self, key, d_model=D_MODEL, n_levels=N_LEVELS, n_heads=N_HEADS,
                 n_points=N_POINTS, low_precision=False):
        assert d_model % n_heads == 0
        self.d_model = d_model
        self.n_levels = n_levels
        self.n_heads = n_heads
        self.n_points = n_points
        self.low_precision = low_precision
        # TODO(synk): im2col_step only affects the CUDA batching strategy, not the math.

        k1, k2 = jax.random.split(key)

        # sampling_offsets: weight = 0, bias = directional grid init (as in _reset_parameters)
        self.sampling_offsets_w = jnp.zeros(
            (d_model, n_heads * n_levels * n_points * 2), jnp.float32)
        thetas = jnp.arange(n_heads, dtype=jnp.float32) * (2.0 * math.pi / n_heads)
        grid_init = jnp.stack([jnp.cos(thetas), jnp.sin(thetas)], -1)
        grid_init = grid_init / jnp.max(jnp.abs(grid_init), axis=-1, keepdims=True)
        grid_init = jnp.tile(grid_init.reshape(n_heads, 1, 1, 2),
                             (1, n_levels, n_points, 1))
        scale = jnp.arange(1, n_points + 1, dtype=jnp.float32).reshape(1, 1, n_points, 1)
        self.sampling_offsets_b = (grid_init * scale).reshape(-1)

        # attention_weights: weight = 0, bias = 0
        self.attention_weights_w = jnp.zeros(
            (d_model, n_heads * n_levels * n_points), jnp.float32)
        self.attention_weights_b = jnp.zeros((n_heads * n_levels * n_points,), jnp.float32)

        # fused (sampling_offsets | attention_weights) projection -> one Pallas matmul
        self.samp_attn_w = jnp.concatenate(
            [self.sampling_offsets_w, self.attention_weights_w], axis=1)
        self.samp_attn_b = jnp.concatenate(
            [self.sampling_offsets_b, self.attention_weights_b], axis=0)

        # value_proj / output_proj: xavier_uniform weights (stored (in, out)), zero bias
        a = math.sqrt(6.0 / (d_model + d_model))
        self.value_proj_w = jax.random.uniform(k1, (d_model, d_model), jnp.float32, -a, a)
        self.value_proj_b = jnp.zeros((d_model,), jnp.float32)
        self.output_proj_w = jax.random.uniform(k2, (d_model, d_model), jnp.float32, -a, a)
        self.output_proj_b = jnp.zeros((d_model,), jnp.float32)

    def __call__(self, query, reference_points, input_flatten, input_spatial_shapes,
                 input_level_start_index, input_padding_mask=None):
        N, Lq, D = query.shape
        _, Len_in, _ = input_flatten.shape
        nh, L, P = self.n_heads, self.n_levels, self.n_points
        Dh = D // nh
        ref_dim = reference_points.shape[-1]
        if ref_dim not in (2, 4):
            raise ValueError("Last dim of reference_points must be 2 or 4.")

        # static level geometry (compile-time constants for the kernel)
        # TODO(synk): spatial shapes / level start must be concrete (non-traced) values.
        ss_np = np.asarray(jax.device_get(input_spatial_shapes)).astype(np.int64)
        spatial_shapes = tuple((int(h), int(w)) for h, w in ss_np)
        level_start = tuple(int(s) for s in
                            np.asarray(jax.device_get(input_level_start_index)))
        assert sum(h * w for h, w in spatial_shapes) == Len_in

        # sublane-aligned (multiple-of-8) per-level offsets inside the VMEM value slab
        level_start_pad = []
        off = 0
        for (h, w) in spatial_shapes:
            level_start_pad.append(off)
            off += _round_up(h * w, 8)
        Len_pad = off
        level_start_pad = tuple(level_start_pad)

        mxu_dtype = jnp.bfloat16 if self.low_precision else jnp.float32

        # ---- value projection (padding mask fused into the matmul kernel) ----
        mask_flat = None
        if input_padding_mask is not None:
            mask_flat = input_padding_mask.reshape(N * Len_in)
        value = linear(input_flatten.reshape(N * Len_in, D),
                       self.value_proj_w, self.value_proj_b, mask=mask_flat)
        value = value.reshape(N, Len_in, D).astype(mxu_dtype)   # bf16 halves DMA if enabled

        # ---- pad Lq to a clean query-tile multiple (no giant single tile) ----
        tq = _round_up(Lq, 8) if Lq <= 128 else 128
        Lq_pad = _round_up(Lq, tq)
        q_pad = jnp.pad(query, ((0, 0), (0, Lq_pad - Lq), (0, 0)))
        refs_pad = jnp.pad(reference_points,
                           ((0, 0), (0, Lq_pad - Lq), (0, 0), (0, 0))
                           ).reshape(N, Lq_pad, L * ref_dim)

        # ---- fused sampling-offsets + attention-logits projection (one matmul) ----
        qproj = linear(q_pad.reshape(N * Lq_pad, D), self.samp_attn_w,
                       self.samp_attn_b).reshape(N, Lq_pad, 3 * nh * L * P)

        # ---- fused deformable-sampling + output-projection kernel ----
        kernel = partial(_ms_deform_attn_kernel,
                         n_heads=nh, n_levels=L, n_points=P, d_head=Dh,
                         ref_dim=ref_dim, spatial_shapes=spatial_shapes,
                         level_start=level_start, level_start_pad=level_start_pad,
                         mxu_dtype=mxu_dtype, approx_recip=self.low_precision)
        out = pl.pallas_call(
            kernel,
            grid=(N, Lq_pad // tq),
            out_shape=jax.ShapeDtypeStruct((N, Lq_pad, D), jnp.float32),
            in_specs=[
                pl.BlockSpec((1, tq, 3 * nh * L * P), lambda b, q: (b, q, 0)),
                pl.BlockSpec((1, tq, L * ref_dim), lambda b, q: (b, q, 0)),
                pl.BlockSpec(memory_space=pl.ANY),          # value stays in HBM
                pl.BlockSpec((D, D), lambda b, q: (0, 0)),
                pl.BlockSpec((1, D), lambda b, q: (0, 0)),
            ],
            out_specs=pl.BlockSpec((1, tq, D), lambda b, q: (b, q, 0)),
            scratch_shapes=[
                pltpu.VMEM((Len_pad, D), mxu_dtype),        # single-buffered value slab
                pltpu.SemaphoreType.DMA((L,)),
            ],
            compiler_params=pltpu.CompilerParams(
                # batch axis is the megacore ("parallel") axis so both v7x cores never
                # re-DMA the same value slab; query-tile axis is sequential.
                dimension_semantics=("parallel", "arbitrary"),
                vmem_limit_bytes=VMEM_LIMIT),
        )(qproj, refs_pad, value, self.output_proj_w,
          self.output_proj_b.reshape(1, D))
        return out[:, :Lq, :]


# ---------------- pure-JAX reference (mirrors the PyTorch semantics) ----------------
def reference_forward(mod, query, reference_points, input_flatten, spatial_shapes_np,
                      lsi_np, input_padding_mask=None):
    N, Lq, D = query.shape
    _, Len_in, _ = input_flatten.shape
    nh, L, P = mod.n_heads, mod.n_levels, mod.n_points
    Dh = D // nh

    value = input_flatten @ mod.value_proj_w + mod.value_proj_b
    if input_padding_mask is not None:
        value = jnp.where(input_padding_mask[..., None], 0.0, value)
    value = value.reshape(N, Len_in, nh, Dh)

    so = (query @ mod.sampling_offsets_w + mod.sampling_offsets_b).reshape(
        N, Lq, nh, L, P, 2)
    aw = (query @ mod.attention_weights_w + mod.attention_weights_b).reshape(
        N, Lq, nh, L * P)
    aw = jax.nn.softmax(aw, axis=-1).reshape(N, Lq, nh, L, P)

    ss = jnp.asarray(spatial_shapes_np, jnp.float32)
    offset_normalizer = jnp.stack([ss[:, 1], ss[:, 0]], -1)
    loc = (reference_points[:, :, None, :, None, :]
           + so / offset_normalizer[None, None, None, :, None, :])

    out = jnp.zeros((N, Lq, nh, Dh), jnp.float32)
    off = 0
    n_idx = jnp.arange(N)[:, None, None, None]
    h_idx = jnp.arange(nh)[None, None, :, None]
    for l in range(L):
        H, W = int(spatial_shapes_np[l, 0]), int(spatial_shapes_np[l, 1])
        val_l = value[:, off:off + H * W].reshape(N, H, W, nh, Dh)
        loc_l = loc[:, :, :, l]                      # (N, Lq, nh, P, 2)
        x = loc_l[..., 0] * W - 0.5
        y = loc_l[..., 1] * H - 0.5
        x0 = jnp.floor(x).astype(jnp.int32)
        y0 = jnp.floor(y).astype(jnp.int32)
        fx = x - x0
        fy = y - y0
        samp = jnp.zeros((N, Lq, nh, P, Dh), jnp.float32)
        for dy in (0, 1):
            for dx in (0, 1):
                xi = x0 + dx
                yi = y0 + dy
                w = (fx if dx else 1.0 - fx) * (fy if dy else 1.0 - fy)
                valid = (xi >= 0) & (xi < W) & (yi >= 0) & (yi < H)
                xi_c = jnp.clip(xi, 0, W - 1)
                yi_c = jnp.clip(yi, 0, H - 1)
                v = val_l[n_idx, yi_c, xi_c, h_idx]     # (N, Lq, nh, P, Dh)
                samp = samp + (w * valid)[..., None] * v
        out = out + jnp.sum(aw[:, :, :, l][..., None] * samp, axis=3)
        off += H * W

    out = out.reshape(N, Lq, D)
    return out @ mod.output_proj_w + mod.output_proj_b


if __name__ == "__main__":
    key = jax.random.PRNGKey(0)
    kp, kq, kf, kr = jax.random.split(key, 4)

    N, Lq = 2, 10
    spatial_shapes_np = np.array([[8, 8], [4, 4], [2, 2], [1, 1]], dtype=np.int32)
    areas = spatial_shapes_np[:, 0] * spatial_shapes_np[:, 1]
    lsi_np = np.concatenate([[0], np.cumsum(areas)[:-1]]).astype(np.int32)
    Len_in = int(areas.sum())

    query = jax.random.normal(kq, (N, Lq, D_MODEL), jnp.float32)
    input_flatten = jax.random.normal(kf, (N, Len_in, D_MODEL), jnp.float32)
    reference_points = jax.random.uniform(kr, (N, Lq, N_LEVELS, 2), jnp.float32)
    padding_mask = jnp.zeros((N, Len_in), bool).at[1, -5:].set(True)

    ss = jnp.asarray(spatial_shapes_np)
    lsi = jnp.asarray(lsi_np)

    # ---- full-precision run (tight tolerance) ----
    module = MSDeformAttnPallas(kp)
    out = module(query, reference_points, input_flatten, ss, lsi, padding_mask)
    out = jax.block_until_ready(out)

    ref = reference_forward(module, query, reference_points, input_flatten,
                            spatial_shapes_np, lsi_np, padding_mask)
    np.testing.assert_allclose(np.asarray(out), np.asarray(ref), rtol=1e-4, atol=1e-4)

    # ---- low-precision run (bf16 MXU operands + approx softmax reciprocal) ----
    # Same weights (same PRNG key); compared at a looser tolerance.
    module_lp = MSDeformAttnPallas(kp, low_precision=True)
    out_lp = jax.block_until_ready(
        module_lp(query, reference_points, input_flatten, ss, lsi, padding_mask))
    np.testing.assert_allclose(np.asarray(out_lp), np.asarray(ref), rtol=5e-2, atol=5e-2)

    print("KERNEL_OK")
</pallas_src>

<mosaic_0001>
module attributes {stable_mosaic.version = 11 : i64} {
  func.func @_linear_mask_kernel(%arg0: i32, %arg1: memref<170x32xf32, #tpu.memory_space<vmem>>, %arg2: memref<32x32xf32, #tpu.memory_space<vmem>>, %arg3: memref<1x32xf32, #tpu.memory_space<vmem>>, %arg4: memref<170x1xf32, #tpu.memory_space<vmem>>, %arg5: memref<170x32xf32, #tpu.memory_space<vmem>>) attributes {dimension_semantics = [#tpu.dimension_semantics<parallel>], iteration_bounds = array<i64: 1>, scalar_prefetch = 0 : i64, scratch_operands = 0 : i64, tpu.core_type = #tpu.core_type<tc>, window_params = [{transform_indices = @transform_0, window_bounds = array<i64: 170, 32>}, {pipeline_mode = #tpu.pipeline_mode<synchronous>, transform_indices = @transform_1, window_bounds = array<i64: 32, 32>}, {pipeline_mode = #tpu.pipeline_mode<synchronous>, transform_indices = @transform_2, window_bounds = array<i64: 1, 32>}, {transform_indices = @transform_3, window_bounds = array<i64: 170, 1>}, {transform_indices = @transform_4, window_bounds = array<i64: 170, 32>}]} {
    %c0 = arith.constant 0 : index
    %c0_0 = arith.constant 0 : index
    %0 = vector.load %arg1[%c0, %c0_0] : memref<170x32xf32, #tpu.memory_space<vmem>>, vector<170x32xf32>
    %c0_1 = arith.constant 0 : index
    %c0_2 = arith.constant 0 : index
    %1 = vector.load %arg2[%c0_1, %c0_2] : memref<32x32xf32, #tpu.memory_space<vmem>>, vector<32x32xf32>
    %cst = arith.constant dense<0.000000e+00> : vector<170x32xf32>
    %2 = tpu.matmul %0, %1, %cst {dimension_numbers = #tpu.dot_dimension_numbers<[1], [0], [0], [1], [0, 0, 1, 1], [], []>} : vector<170x32xf32>, vector<32x32xf32>, vector<170x32xf32> -> vector<170x32xf32>
    %c0_3 = arith.constant 0 : index
    %c0_4 = arith.constant 0 : index
    %3 = vector.load %arg3[%c0_3, %c0_4] : memref<1x32xf32, #tpu.memory_space<vmem>>, vector<1x32xf32>
    %4 = vector.broadcast %3 : vector<1x32xf32> to vector<170x32xf32>
    %5 = arith.addf %2, %4 : vector<170x32xf32>
    %c0_5 = arith.constant 0 : index
    %c0_6 = arith.constant 0 : index
    %6 = vector.load %arg4[%c0_5, %c0_6] : memref<170x1xf32, #tpu.memory_space<vmem>>, vector<170x1xf32>
    %cst_7 = arith.constant 5.000000e-01 : f32
    %7 = vector.broadcast %cst_7 : f32 to vector<170x1xf32>
    %8 = arith.cmpf ogt, %6, %7 : vector<170x1xf32>
    %cst_8 = arith.constant 0.000000e+00 : f32
    %9 = vector.shape_cast %8 : vector<170x1xi1> to vector<170x1xi1>
    %10 = vector.broadcast %9 : vector<170x1xi1> to vector<170x32xi1>
    %11 = vector.broadcast %cst_8 : f32 to vector<170x32xf32>
    %12 = arith.select %10, %11, %5 : vector<170x32xi1>, vector<170x32xf32>
    %c0_9 = arith.constant 0 : index
    %c0_10 = arith.constant 0 : index
    %13 = vector.load %arg5[%c0_9, %c0_10] : memref<170x32xf32, #tpu.memory_space<vmem>>, vector<170x32xf32>
    tpu.vector_store %arg5[%c0_9, %c0_10], %12 {strides = array<i32>} : memref<170x32xf32, #tpu.memory_space<vmem>>, vector<170x32xf32>,
    return
  }
  func.func @transform_0(%arg0: i32) -> (i32, i32) {
    %c0_i32 = arith.constant 0 : i32
    %c0_i32_0 = arith.constant 0 : i32
    return %arg0, %c0_i32 : i32, i32
  }
  func.func @transform_1(%arg0: i32) -> (i32, i32) {
    %c0_i32 = arith.constant 0 : i32
    %c0_i32_0 = arith.constant 0 : i32
    %c0_i32_1 = arith.constant 0 : i32
    return %c0_i32, %c0_i32_0 : i32, i32
  }
  func.func @transform_2(%arg0: i32) -> (i32, i32) {
    %c0_i32 = arith.constant 0 : i32
    %c0_i32_0 = arith.constant 0 : i32
    %c0_i32_1 = arith.constant 0 : i32
    return %c0_i32, %c0_i32_0 : i32, i32
  }
  func.func @transform_3(%arg0: i32) -> (i32, i32) {
    %c0_i32 = arith.constant 0 : i32
    %c0_i32_0 = arith.constant 0 : i32
    return %arg0, %c0_i32 : i32, i32
  }
  func.func @transform_4(%arg0: i32) -> (i32, i32) {
    %c0_i32 = arith.constant 0 : i32
    %c0_i32_0 = arith.constant 0 : i32
    return %arg0, %c0_i32 : i32, i32
  }
}

</mosaic_0001>

<bundles_post_ra>
// kernel: tpu_custom_call.1
= control target key start
LH: loop header
LB: loop body
LE: loop exit
PB: predicated region body
PF: predicated region fallthrough
CT: control target
= control target key end

     0   :  { %v596_v2 = vmov 0   ;;  %vm50_vm0 = vcmask 261120   ;;  %s951_s1 = inlined_call_operand.vmem [shape: f32[32,32], index: 1, kind: input, shape index: {}]   ;;  %s952_s0 = inlined_call_operand.vmem [shape: f32[170,32], index: 0, kind: input, shape index: {}]   ;;  %s953_s3 = inlined_call_operand.vmem [shape: f32[170,1], index: 3, kind: input, shape index: {}]   ;;  %s954_s2 = inlined_call_operand.vmem [shape: f32[1,32], index: 2, kind: input, shape index: {}]   ;;  %s955_s4 = inlined_call_operand.vmem [shape: f32[170,32], index: 4, kind: output, shape index: {}]  }
   0x1   :  { %v42_v0 = vld [vmem:[%s951_s1 + $0x18] sm:$0xff]  ;;  %v41_v1 = vld [vmem:[%s951_s1 + $0x10] sm:$0xff]  ;;  %595 = vset.pattern.permute.xlu1 %v596_v2  ;;  %594 = vset.pattern.permute.xlu0 %v596_v2  ;;  %v40_v3 = vld [vmem:[%s951_s1 + $0x8] sm:$0xff] }
   0x2   :  { %544 = vmatprep.subr.mxu0 %v42_v0  ;;  %585 = vmatprep.subr.mxu1 %v42_v0  ;;  %v39_v4 = vld [vmem:[%s951_s1] sm:$0xff]  ;;  %v294_v7 = vld [vmem:[%s953_s3 + $0x10] sm:$0xff]  ;;  %v18_v9 = vld [vmem:[%s952_s0 + $0x8] sm:$0xff] }
   0x3   :  { %545 = vmatpush3.msra.mxu0 %v42_v0  ;;  %589 = vmatpush3.msra.mxu1 %v42_v0  ;;  %v17_v5 = vld [vmem:[%s952_s0] sm:$0xff]  ;;  %v30_v10 = vld [vmem:[%s952_s0 + $0x68] sm:$0xff]  ;;  %v19_v11 = vld [vmem:[%s952_s0 + $0x10] sm:$0xff]  ;;  %vm316_vm1 = vcmp.gt.f32.partialorder %v294_v7, 0.5 }
   0x4   :  { %546 = vmatprep.subr.mxu0 %v41_v1  ;;  %586 = vmatprep.subr.mxu1 %v41_v1  ;;  %v29_v6 = vld [vmem:[%s952_s0 + $0x60] sm:$0xff]  ;;  %v31_v12 = vld [vmem:[%s952_s0 + $0x70] sm:$0xff]  ;;  %v295_v13 = vld [vmem:[%s953_s3 + $0x18] sm:$0xff]  ;;  %v338_v15 = vsel %vm316_vm1, 1, %v596_v2 }
   0x5   :  { %547 = vmatpush3.msra.mxu0 %v41_v1  ;;  %590 = vmatpush3.msra.mxu1 %v41_v1  ;;  %v292_v8 = vld [vmem:[%s953_s3] sm:$0xff]  ;;  %v293_v14 = vld [vmem:[%s953_s3 + $0x8] sm:$0xff]  ;;  %v20_v17 = vld [vmem:[%s952_s0 + $0x18] sm:$0xff]  ;;  %vm317_vm3 = vcmp.gt.f32.partialorder %v295_v13, 0.5 }
   0x6   :  { %548 = vmatprep.subr.mxu0 %v40_v3  ;;  %587 = vmatprep.subr.mxu1 %v40_v3  ;;  %vm314_vm2 = vcmp.gt.f32.partialorder %v292_v8, 0.5  ;;  %vm315_vm4 = vcmp.gt.f32.partialorder %v293_v14, 0.5  ;;  %v32_v18 = vld [vmem:[%s952_s0 + $0x78] sm:$0xff]  ;;  %v297_v19 = vld [vmem:[%s953_s3 + $0x28] sm:$0xff]  ;;  %v296_v20 = vld [vmem:[%s953_s3 + $0x20] sm:$0xff]  ;;  %v339_v23 = vsel %vm317_vm3, 1, %v596_v2 }
   0x7   :  { %549 = vmatpush3.msra.mxu0 %v40_v3  ;;  %591 = vmatpush3.msra.mxu1 %v40_v3  ;;  %v336_v16 = vsel %vm314_vm2, 1, %v596_v2  ;;  %v21_v21 = vld [vmem:[%s952_s0 + $0x20] sm:$0xff]  ;;  %v337_v24 = vsel %vm315_vm4, 1, %v596_v2  ;;  %v22_v25 = vld [vmem:[%s952_s0 + $0x28] sm:$0xff]  ;;  %vm319_vm5 = vcmp.gt.f32.partialorder %v297_v19, 0.5  ;;  %vm318_vm6 = vcmp.gt.f32.partialorder %v296_v20, 0.5 }
   0x8   :  { %550 = vmatprep.subr.mxu0 %v39_v4  ;;  %588 = vmatprep.subr.mxu1 %v39_v4  ;;  %v33_v22 = vld [vmem:[%s952_s0 + $0x80] sm:$0xff]  ;;  %v34_v26 = vld [vmem:[%s952_s0 + $0x88] sm:$0xff]  ;;  %v299_v27 = vld [vmem:[%s953_s3 + $0x38] sm:$0xff]  ;;  %v341_v31 = vsel %vm319_vm5, 1, %v596_v2  ;;  %v340_v32 = vsel %vm318_vm6, 1, %v596_v2 }
   0x9   :  { %551 = vmatpush3.msra.mxu0 %v39_v4  ;;  %592 = vmatpush3.msra.mxu1 %v39_v4  ;;  %v298_v28 = vld [vmem:[%s953_s3 + $0x30] sm:$0xff]  ;;  %v24_v33 = vld [vmem:[%s952_s0 + $0x38] sm:$0xff]  ;;  %vm321_vm7 = vcmp.gt.f32.partialorder %v299_v27, 0.5  ;;  %v301_v35 = vld [vmem:[%s953_s3 + $0x48] sm:$0xff] }
   0xa   :  { %552 = vmatprep.mubr.msk.f32.mxu0 %vm50_vm0, %v17_v5  ;;  %570 = vmatprep.mubr.msk.f32.mxu1 %vm50_vm0, %v29_v6  ;;  %v23_v29 = vld [vmem:[%s952_s0 + $0x30] sm:$0xff]  ;;  %vm320_vm8 = vcmp.gt.f32.partialorder %v298_v28, 0.5  ;;  %v36_v34 = vld [vmem:[%s952_s0 + $0x98] sm:$0xff]  ;;  %v300_v36 = vld [vmem:[%s953_s3 + $0x40] sm:$0xff]  ;;  %v343_v39 = vsel %vm321_vm7, 1, %v596_v2  ;;  %vm323_vm9 = vcmp.gt.f32.partialorder %v301_v35, 0.5 }
   0xb   :  { %553 = vmatmul.mubr.msk.f32.vlgmr.msra.gmra.mxu0 %vm50_vm0, %v18_v9  ;;  %571 = vmatmul.mubr.msk.f32.vlgmr.msra.gmra.mxu1 %vm50_vm0, %v30_v10  ;;  %v35_v30 = vld [vmem:[%s952_s0 + $0x90] sm:$0xff]  ;;  %v25_v37 = vld [vmem:[%s952_s0 + $0x40] sm:$0xff]  ;;  %v342_v40 = vsel %vm320_vm8, 1, %v596_v2  ;;  %v26_v41 = vld [vmem:[%s952_s0 + $0x48] sm:$0xff]  ;;  %vm322_vm10 = vcmp.gt.f32.partialorder %v300_v36, 0.5  ;;  %v345_v46 = vsel %vm323_vm9, 1, %v596_v2 }
   0xc   :  { %555 = vmatprep.mubr.msk.f32.mxu0 %vm50_vm0, %v19_v11  ;;  %573 = vmatprep.mubr.msk.f32.mxu1 %vm50_vm0, %v31_v12  ;;  %v37_v38 = vld [vmem:[%s952_s0 + $0xa0] sm:$0xff]  ;;  %v38_v42 = vld [vmem:[%s952_s0 + $0xa8] sm:$0x3]  ;;  %v303_v43 = vld [vmem:[%s953_s3 + $0x58] sm:$0xff]  ;;  %v344_v47 = vsel %vm322_vm10, 1, %v596_v2 }
   0xd   :  { %365 = vperm.xlu1 %595, %v338_v15   ;;  %359 = vperm.xlu0 %594, %v336_v16   ;;  %v302_v44 = vld [vmem:[%s953_s3 + $0x50] sm:$0xff]  ;;  %vm325_vm11 = vcmp.gt.f32.partialorder %v303_v43, 0.5  ;;  %v28_v48 = vld [vmem:[%s952_s0 + $0x58] sm:$0xff]  ;;  %v305_v49 = vld [vmem:[%s953_s3 + $0x68] sm:$0xff] }
   0xe   :  { %v27_v45 = vld [vmem:[%s952_s0 + $0x50] sm:$0xff]  ;;  %vm324_vm12 = vcmp.gt.f32.partialorder %v302_v44, 0.5  ;;  %v304_v50 = vld [vmem:[%s953_s3 + $0x60] sm:$0xff]  ;;  %v347_v51 = vsel %vm325_vm11, 1, %v596_v2  ;;  %vm327_vm13 = vcmp.gt.f32.partialorder %v305_v49, 0.5  ;;  %v307_v53 = vld [vmem:[%s953_s3 + $0x78] sm:$0xff] }
   0xf   :  { %556 = vmatmul.mubr.msk.f32.gmra.mxu0 %vm50_vm0, %v20_v17  ;;  %574 = vmatmul.mubr.msk.f32.gmra.mxu1 %vm50_vm0, %v32_v18  ;;  %v346_v52 = vsel %vm324_vm12, 1, %v596_v2  ;;  %vm326_vm14 = vcmp.gt.f32.partialorder %v304_v50, 0.5  ;;  %v306_v54 = vld [vmem:[%s953_s3 + $0x70] sm:$0xff]  ;;  %v349_v55 = vsel %vm327_vm13, 1, %v596_v2  ;;  %vm329_vm15 = vcmp.gt.f32.partialorder %v307_v53, 0.5  ;;  %v309_v57 = vld [vmem:[%s953_s3 + $0x88] sm:$0xff] }
  0x10   :  { %558 = vmatprep.mubr.msk.f32.mxu0 %vm50_vm0, %v21_v21  ;;  %576 = vmatprep.mubr.msk.f32.mxu1 %vm50_vm0, %v33_v22  ;;  %v348_v56 = vsel %vm326_vm14, 1, %v596_v2  ;;  %vm328_vm1 = vcmp.gt.f32.partialorder %v306_v54, 0.5  ;;  %v308_v58 = vld [vmem:[%s953_s3 + $0x80] sm:$0xff]  ;;  %v351_v59 = vsel %vm329_vm15, 1, %v596_v2  ;;  %vm331_vm2 = vcmp.gt.f32.partialorder %v309_v57, 0.5  ;;  %v311_v61 = vld [vmem:[%s953_s3 + $0x98] sm:$0xff] }
  0x11   :  { %368 = vperm.xlu1 %595, %v339_v23   ;;  %362 = vperm.xlu0 %594, %v337_v24   ;;  %v350_v60 = vsel %vm328_vm1, 1, %v596_v2  ;;  %vm330_vm3 = vcmp.gt.f32.partialorder %v308_v58, 0.5  ;;  %v310_v62 = vld [vmem:[%s953_s3 + $0x90] sm:$0xff]  ;;  %v353_v63 = vsel %vm331_vm2, 1, %v596_v2  ;;  %vm333_vm4 = vcmp.gt.f32.partialorder %v311_v61, 0.5  ;;  %v312_v3 = vld [vmem:[%s953_s3 + $0xa0] sm:$0xff] }
  0x12   :  { %v352_v0 = vsel %vm330_vm3, 1, %v596_v2  ;;  %vm332_vm5 = vcmp.gt.f32.partialorder %v310_v62, 0.5  ;;  %v313_v1 = vld [vmem:[%s953_s3 + $0xa8] sm:$0x3]  ;;  %v355_v4 = vsel %vm333_vm4, 1, %v596_v2  ;;  %vm334_vm7 = vcmp.gt.f32.partialorder %v312_v3, 0.5 }
  0x13   :  { %559 = vmatmul.mubr.msk.f32.gmra.mxu0 %vm50_vm0, %v22_v25  ;;  %577 = vmatmul.mubr.msk.f32.gmra.mxu1 %vm50_vm0, %v34_v26  ;;  %v354_v5 = vsel %vm332_vm5, 1, %v596_v2  ;;  %vm335_vm6 = vcmp.gt.f32.partialorder %v313_v1, 0.5  ;;  %v356_v7 = vsel %vm334_vm7, 1, %v596_v2  ;;  %v831_v22 = vld [vmem:[%s954_s2] ss:$0 sm:$0xff] }
  0x14   :  { %561 = vmatprep.mubr.msk.f32.mxu0 %vm50_vm0, %v23_v29  ;;  %579 = vmatprep.mubr.msk.f32.mxu1 %vm50_vm0, %v35_v30  ;;  %v357_v6 = vsel %vm335_vm6, 1, %v596_v2 }
  0x15   :  { %374 = vperm.xlu1 %595, %v341_v31   ;;  %371 = vperm.xlu0 %594, %v340_v32  }
  0x17   :  { %562 = vmatmul.mubr.msk.f32.gmra.mxu0 %vm50_vm0, %v24_v33  ;;  %580 = vmatmul.mubr.msk.f32.gmra.mxu1 %vm50_vm0, %v36_v34 }
  0x18   :  { %564 = vmatprep.mubr.msk.f32.mxu0 %vm50_vm0, %v25_v37  ;;  %582 = vmatprep.mubr.msk.f32.mxu1 %vm50_vm0, %v37_v38 }
  0x19   :  { %380 = vperm.xlu1 %595, %v343_v39   ;;  %377 = vperm.xlu0 %594, %v342_v40  }
  0x1b   :  { %565 = vmatmul.mubr.msk.f32.gmra.mxu0 %vm50_vm0, %v26_v41  ;;  %583 = vmatmul.mubr.msk.f32.gmra.mxu1 %vm50_vm0, %v38_v42 }
  0x1c   :  { %567 = vmatprep.mubr.msk.f32.mxu0 %vm50_vm0, %v27_v45 }
  0x1d   :  { %386 = vperm.xlu1 %595, %v345_v46   ;;  %383 = vperm.xlu0 %594, %v344_v47  }
  0x1f   :  { %568 = vmatmul.mubr.msk.f32.gmra.mxu0 %vm50_vm0, %v28_v48 }
  0x21   :  { %392 = vperm.xlu1 %595, %v347_v51   ;;  %389 = vperm.xlu0 %594, %v346_v52  }
  0x25   :  { %398 = vperm.xlu1 %595, %v349_v55   ;;  %395 = vperm.xlu0 %594, %v348_v56  }
  0x29   :  { %404 = vperm.xlu1 %595, %v351_v59   ;;  %401 = vperm.xlu0 %594, %v350_v60  }
  0x2d   :  { %410 = vperm.xlu1 %595, %v353_v63   ;;  %407 = vperm.xlu0 %594, %v352_v0  }
  0x31   :  { %416 = vperm.xlu1 %595, %v355_v4   ;;  %413 = vperm.xlu0 %594, %v354_v5  }
  0x35   :  { %422 = vperm.xlu1 %595, %v357_v6   ;;  %419 = vperm.xlu0 %594, %v356_v7  }
  0x88   :  { %v366_v8 = vpop.permute.xlu1 %365  ;;  %v360_v9 = vpop.permute.xlu0 %359 }
  0x89   :  { %vm424_vm10 = vcmp.eq.s32.totalorder %v360_v9, 1  ;;  %vm426_vm14 = vcmp.eq.s32.totalorder %v366_v8, 1 }
  0x8c   :  { %v369_v10 = vpop.permute.xlu1 %368  ;;  %v363_v11 = vpop.permute.xlu0 %362 }
  0x8d   :  { %vm425_vm8 = vcmp.eq.s32.totalorder %v363_v11, 1  ;;  %vm427_vm12 = vcmp.eq.s32.totalorder %v369_v10, 1 }
  0x90   :  { %v812_v12 = vpop.permute.xlu1 %374  ;;  %v814_v13 = vpop.permute.xlu0 %371 }
  0x91   :  { %vm429_vm1 = vcmp.eq.s32.totalorder %v812_v12, 1  ;;  %vm428_vm3 = vcmp.eq.s32.totalorder %v814_v13, 1 }
  0x94   :  { %v816_v14 = vpop.permute.xlu1 %380  ;;  %v818_v15 = vpop.permute.xlu0 %377 }
  0x95   :  { %vm431_vm5 = vcmp.eq.s32.totalorder %v816_v14, 1  ;;  %vm430_vm7 = vcmp.eq.s32.totalorder %v818_v15, 1 }
  0x98   :  { %v820_v16 = vpop.permute.xlu1 %386  ;;  %v822_v17 = vpop.permute.xlu0 %383 }
  0x9c   :  { %v824_v18 = vpop.permute.xlu1 %392  ;;  %v826_v2 = vpop.permute.xlu0 %389 }
  0xa0   :  { %v399_v19 = vpop.permute.xlu1 %398  ;;  %v396_v20 = vpop.permute.xlu0 %395 }
  0xa1   :  { %vm437_vm9 = vcmp.eq.s32.totalorder %v399_v19, 1  ;;  %vm436_vm11 = vcmp.eq.s32.totalorder %v396_v20, 1 }
  0xa4   :  { %v405_v21 = vpop.permute.xlu1 %404  ;;  %v402_v23 = vpop.permute.xlu0 %401 }
  0xa5   :  { %vm439_vm13 = vcmp.eq.s32.totalorder %v405_v21, 1  ;;  %vm438_vm15 = vcmp.eq.s32.totalorder %v402_v23, 1 }
  0xa8   :  { %v411_v30 = vpop.permute.xlu1 %410  ;;  %v408_v37 = vpop.permute.xlu0 %407 }
  0xa9   :  { %vm441_vm2 = vcmp.eq.s32.totalorder %v411_v30, 1  ;;  %vm440_vm4 = vcmp.eq.s32.totalorder %v408_v37, 1 }
  0xac   :  { %v417_v50 = vpop.permute.xlu1 %416  ;;  %v414_v57 = vpop.permute.xlu0 %413 }
  0xad   :  { %vm443_vm6 = vcmp.eq.s32.totalorder %v417_v50, 1 }
  0xb0   :  { %v423_v7 = vpop.permute.xlu1 %422  ;;  %v420_v14 = vpop.permute.xlu0 %419 }
  0xcb   :  { %v554_v24 = vpop.f32.mrf.mxu0  ;;  %v572_v25 = vpop.f32.mrf.mxu1 }
  0xcc   :  { %v189_v26 = vadd.f32 %v554_v24, %v831_v22  ;;  %v249_v27 = vadd.f32 %v572_v25, %v831_v22 }
  0xcd   :  { %v183_v28 = vpop.f32.mrf.mxu0  ;;  %v243_v29 = vpop.f32.mrf.mxu1 }
  0xce   :  { %v447_v31 = vsel %vm425_vm8, 0.0, %v189_v26  ;;  %v459_v32 = vsel %vm437_vm9, 0.0, %v249_v27  ;;  %v184_v33 = vadd.f32 %v831_v22, %v183_v28  ;;  %v244_v34 = vadd.f32 %v831_v22, %v243_v29 }
  0xcf   :  { %469 = vst.msk [vmem:[%s955_s4 + $0x8] sm:$0xff] %vm50_vm0, %v447_v31  ;;  %481 = vst.msk [vmem:[%s955_s4 + $0x68] sm:$0xff] %vm50_vm0, %v459_v32  ;;  %v557_v35 = vpop.f32.mrf.mxu0  ;;  %v575_v36 = vpop.f32.mrf.mxu1  ;;  %vm442_vm8 = vcmp.eq.s32.totalorder %v414_v57, 1  ;;  %vm489_vm9 = vcmask 254976  }
  0xd0   :  { %v446_v38 = vsel %vm424_vm10, 0.0, %v184_v33  ;;  %v458_v39 = vsel %vm436_vm11, 0.0, %v244_v34  ;;  %v199_v40 = vadd.f32 %v557_v35, %v831_v22  ;;  %v259_v41 = vadd.f32 %v575_v36, %v831_v22 }
  0xd1   :  { %468 = vst.msk [vmem:[%s955_s4] sm:$0xff] %vm50_vm0, %v446_v38  ;;  %480 = vst.msk [vmem:[%s955_s4 + $0x60] sm:$0xff] %vm50_vm0, %v458_v39  ;;  %v193_v42 = vpop.f32.mrf.mxu0  ;;  %v253_v43 = vpop.f32.mrf.mxu1  ;;  %vm433_vm10 = vcmp.eq.s32.totalorder %v820_v16, 1  ;;  %vm445_vm11 = vcmp.eq.s32.totalorder %v423_v7, 1 }
  0xd2   :  { %v449_v44 = vsel %vm427_vm12, 0.0, %v199_v40  ;;  %v461_v45 = vsel %vm439_vm13, 0.0, %v259_v41  ;;  %v194_v46 = vadd.f32 %v831_v22, %v193_v42  ;;  %v254_v47 = vadd.f32 %v831_v22, %v253_v43 }
  0xd3   :  { %471 = vst.msk [vmem:[%s955_s4 + $0x18] sm:$0xff] %vm50_vm0, %v449_v44  ;;  %483 = vst.msk [vmem:[%s955_s4 + $0x78] sm:$0xff] %vm50_vm0, %v461_v45  ;;  %v560_v48 = vpop.f32.mrf.mxu0  ;;  %v578_v49 = vpop.f32.mrf.mxu1  ;;  %vm432_vm12 = vcmp.eq.s32.totalorder %v822_v17, 1  ;;  %vm444_vm13 = vcmp.eq.s32.totalorder %v420_v14, 1 }
  0xd4   :  { %v448_v51 = vsel %vm426_vm14, 0.0, %v194_v46  ;;  %v460_v52 = vsel %vm438_vm15, 0.0, %v254_v47  ;;  %v209_v53 = vadd.f32 %v560_v48, %v831_v22  ;;  %v269_v54 = vadd.f32 %v578_v49, %v831_v22 }
  0xd5   :  { %470 = vst.msk [vmem:[%s955_s4 + $0x10] sm:$0xff] %vm50_vm0, %v448_v51  ;;  %482 = vst.msk [vmem:[%s955_s4 + $0x70] sm:$0xff] %vm50_vm0, %v460_v52  ;;  %v203_v55 = vpop.f32.mrf.mxu0  ;;  %v263_v56 = vpop.f32.mrf.mxu1  ;;  %vm435_vm14 = vcmp.eq.s32.totalorder %v824_v18, 1  ;;  %vm434_vm15 = vcmp.eq.s32.totalorder %v826_v2, 1 }
  0xd6   :  { %v451_v58 = vsel %vm429_vm1, 0.0, %v209_v53  ;;  %v463_v59 = vsel %vm441_vm2, 0.0, %v269_v54  ;;  %v204_v60 = vadd.f32 %v831_v22, %v203_v55  ;;  %v264_v61 = vadd.f32 %v831_v22, %v263_v56 }
  0xd7   :  { %473 = vst.msk [vmem:[%s955_s4 + $0x28] sm:$0xff] %vm50_vm0, %v451_v58  ;;  %485 = vst.msk [vmem:[%s955_s4 + $0x88] sm:$0xff] %vm50_vm0, %v463_v59  ;;  %v563_v62 = vpop.f32.mrf.mxu0  ;;  %v581_v63 = vpop.f32.mrf.mxu1 }
  0xd8   :  { %v450_v0 = vsel %vm428_vm3, 0.0, %v204_v60  ;;  %v462_v1 = vsel %vm440_vm4, 0.0, %v264_v61  ;;  %v219_v3 = vadd.f32 %v563_v62, %v831_v22  ;;  %v279_v4 = vadd.f32 %v581_v63, %v831_v22 }
  0xd9   :  { %472 = vst.msk [vmem:[%s955_s4 + $0x20] sm:$0xff] %vm50_vm0, %v450_v0  ;;  %484 = vst.msk [vmem:[%s955_s4 + $0x80] sm:$0xff] %vm50_vm0, %v462_v1  ;;  %v213_v5 = vpop.f32.mrf.mxu0  ;;  %v273_v6 = vpop.f32.mrf.mxu1 }
  0xda   :  { %v453_v8 = vsel %vm431_vm5, 0.0, %v219_v3  ;;  %v465_v9 = vsel %vm443_vm6, 0.0, %v279_v4  ;;  %v214_v10 = vadd.f32 %v831_v22, %v213_v5  ;;  %v274_v11 = vadd.f32 %v831_v22, %v273_v6 }
  0xdb   :  { %475 = vst.msk [vmem:[%s955_s4 + $0x38] sm:$0xff] %vm50_vm0, %v453_v8  ;;  %487 = vst.msk [vmem:[%s955_s4 + $0x98] sm:$0xff] %vm50_vm0, %v465_v9  ;;  %v566_v12 = vpop.f32.mrf.mxu0  ;;  %v584_v13 = vpop.f32.mrf.mxu1 }
  0xdc   :  { %v452_v19 = vsel %vm430_vm7, 0.0, %v214_v10  ;;  %v464_v20 = vsel %vm442_vm8, 0.0, %v274_v11  ;;  %v229_v21 = vadd.f32 %v566_v12, %v831_v22  ;;  %v289_v15 = vadd.f32 %v584_v13, %v831_v22 }
  0xdd   :  { %474 = vst.msk [vmem:[%s955_s4 + $0x30] sm:$0xff] %vm50_vm0, %v452_v19  ;;  %486 = vst.msk [vmem:[%s955_s4 + $0x90] sm:$0xff] %vm50_vm0, %v464_v20  ;;  %v223_v23 = vpop.f32.mrf.mxu0  ;;  %v283_v24 = vpop.f32.mrf.mxu1 }
  0xde   :  { %v455_v25 = vsel %vm433_vm10, 0.0, %v229_v21  ;;  %v467_v26 = vsel %vm445_vm11, 0.0, %v289_v15  ;;  %v224_v27 = vadd.f32 %v831_v22, %v223_v23  ;;  %v284_v28 = vadd.f32 %v831_v22, %v283_v24 }
  0xdf   :  { %477 = vst.msk [vmem:[%s955_s4 + $0x48] sm:$0xff] %vm50_vm0, %v455_v25  ;;  %v569_v16 = vpop.f32.mrf.mxu0 }
  0xe0   :  { %490 = vst.msk [vmem:[%s955_s4 + $0xa8] sm:$0x3] %vm489_vm9, %v467_v26  ;;  %v454_v29 = vsel %vm432_vm12, 0.0, %v224_v27  ;;  %v466_v30 = vsel %vm444_vm13, 0.0, %v284_v28  ;;  %v239_v31 = vadd.f32 %v569_v16, %v831_v22 }
  0xe1   :  { %476 = vst.msk [vmem:[%s955_s4 + $0x40] sm:$0xff] %vm50_vm0, %v454_v29  ;;  %488 = vst.msk [vmem:[%s955_s4 + $0xa0] sm:$0xff] %vm50_vm0, %v466_v30  ;;  %v233_v17 = vpop.f32.mrf.mxu0 }
  0xe2   :  { %v457_v32 = vsel %vm435_vm14, 0.0, %v239_v31  ;;  %v234_v33 = vadd.f32 %v831_v22, %v233_v17 }
  0xe3   :  { %479 = vst.msk [vmem:[%s955_s4 + $0x58] sm:$0xff] %vm50_vm0, %v457_v32 }
  0xe4   :  { %v456_v18 = vsel %vm434_vm15, 0.0, %v234_v33 }
  0xe5   :  { %478 = vst.msk [vmem:[%s955_s4 + $0x50] sm:$0xff] %vm50_vm0, %v456_v18 }

</bundles_post_ra>
